<compile_context>
chip_gen: v7x
topology: tpu7x:2x2x1
jax: 0.10.0
libtpu: 0.0.40
codegen_flags: <defaults>
</compile_context>

<pallas_src>
import functools

import jax
import jax.numpy as jnp
from jax import lax
from jax.experimental import pallas as pl
from jax.experimental.pallas import tpu as pltpu


def _round_up(n, m):
    return -(-n // m) * m


def _twin_warp_kernel(mats_ref, coords_ref, img_ref, out1_ref, out2_ref,
                      sel1_ref, sel2_ref, *, H, W, HW_pad):
    """Fused twin affine warp.

    mats_ref   : SMEM (12,) f32 -- two inverse affine matrices [m00..m12] x 2
    coords_ref : VMEM (2, HW_pad) f32 -- centered output-pixel coords (x; y),
                 padded tail is NaN (forces out-of-bounds -> zero fill)
    img_ref    : VMEM (row_tile, HW_pad) f32 -- flattened image rows
    out*_ref   : VMEM (row_tile, HW_pad) f32
    sel*_ref   : VMEM (HW_pad, HW_pad) f32 scratch -- one-hot gather matrices,
                 built once at program_id(0) == 0, reused by all grid steps.
    """

    @pl.when(pl.program_id(0) == 0)
    def _build_selection_matrices():
        xc = coords_ref[0:1, :]                       # (1, HW_pad)
        yc = coords_ref[1:2, :]                       # (1, HW_pad)
        q = lax.broadcasted_iota(jnp.int32, (HW_pad, 1), 0)   # input pixel ids

        def build(sel_ref, base):
            m00 = mats_ref[base + 0]
            m01 = mats_ref[base + 1]
            m02 = mats_ref[base + 2]
            m10 = mats_ref[base + 3]
            m11 = mats_ref[base + 4]
            m12 = mats_ref[base + 5]
            # Inverse affine map: output pixel -> source pixel (float coords).
            src_x = m00 * xc + m01 * yc + m02 + (W - 1) * 0.5
            src_y = m10 * xc + m11 * yc + m12 + (H - 1) * 0.5
            # Nearest-neighbor (RandomAffine default), zeros padding.
            sx = jnp.round(src_x)
            sy = jnp.round(src_y)
            in_bounds = (sx >= 0) & (sx <= W - 1) & (sy >= 0) & (sy <= H - 1)
            sxi = jnp.clip(sx.astype(jnp.int32), 0, W - 1)
            syi = jnp.clip(sy.astype(jnp.int32), 0, H - 1)
            src_idx = syi * W + sxi                   # (1, HW_pad)
            # One-hot: sel[q, p] = 1 iff input pixel q feeds output pixel p.
            sel_ref[...] = jnp.where((q == src_idx) & in_bounds,
                                     1.0, 0.0).astype(jnp.float32)

        build(sel1_ref, 0)
        build(sel2_ref, 6)

    # Steady state: pure MXU work against the resident selection matrices.
    img = img_ref[...]
    out1_ref[...] = jnp.dot(img, sel1_ref[...],
                            preferred_element_type=jnp.float32)
    out2_ref[...] = jnp.dot(img, sel2_ref[...],
                            preferred_element_type=jnp.float32)


def _twin_affine_warp(mats, coords, img, *, H, W, HW_pad, BC_pad, row_tile):
    """img: (BC_pad, HW_pad) f32; mats: (12,) f32; coords: (2, HW_pad) f32."""
    kernel = functools.partial(_twin_warp_kernel, H=H, W=W, HW_pad=HW_pad)

    sel_bytes = 2 * HW_pad * HW_pad * 4
    tile_bytes = row_tile * HW_pad * 4
    est = sel_bytes + 8 * tile_bytes + 2 * HW_pad * 4 + (1 << 20)
    vmem_limit = int(min(max(2 * est, 32 << 20), 64 << 20))
    # TODO(synk): for large images (H*W >~ 2800 the monolithic sel matrices stop
    # fitting v7x's 64 MiB VMEM) add a second grid axis tiling output-pixel
    # columns (sel block (HW_pad, tn)) or switch to a DMA gather.

    return pl.pallas_call(
        kernel,
        out_shape=(
            jax.ShapeDtypeStruct((BC_pad, HW_pad), jnp.float32),
            jax.ShapeDtypeStruct((BC_pad, HW_pad), jnp.float32),
        ),
        grid=(BC_pad // row_tile,),
        in_specs=[
            pl.BlockSpec(memory_space=pltpu.MemorySpace.SMEM),     # mats (12,)
            pl.BlockSpec((2, HW_pad), lambda r: (0, 0)),           # coords
            pl.BlockSpec((row_tile, HW_pad), lambda r: (r, 0)),    # image rows
        ],
        out_specs=(
            pl.BlockSpec((row_tile, HW_pad), lambda r: (r, 0)),
            pl.BlockSpec((row_tile, HW_pad), lambda r: (r, 0)),
        ),
        scratch_shapes=[
            pltpu.VMEM((HW_pad, HW_pad), jnp.float32),
            pltpu.VMEM((HW_pad, HW_pad), jnp.float32),
        ],
        compiler_params=pltpu.CompilerParams(
            # "arbitrary": sel scratch is built once at program_id==0 and must be
            # visible to every subsequent grid step (same core).
            dimension_semantics=("arbitrary",),
            vmem_limit_bytes=vmem_limit,
        ),
    )(mats, coords, img)


# ---------------------------------------------------------------------------
# Plain-JAX glue: RandomAffine parameter sampling + inverse affine matrix
# (torchvision _get_inverse_affine_matrix with the grid_sample
# align_corners=False normalization folded into the kernel's coordinate math).
# ---------------------------------------------------------------------------
def _sample_affine_params(key, H, W, degrees, translate, scale_range, shear):
    k1, k2, k3, k4, k5 = jax.random.split(key, 5)
    angle = jax.random.uniform(k1, (), minval=-degrees, maxval=degrees)
    max_dx = translate[0] * W
    max_dy = translate[1] * H
    tx = jnp.round(jax.random.uniform(k2, (), minval=-max_dx, maxval=max_dx))
    ty = jnp.round(jax.random.uniform(k3, (), minval=-max_dy, maxval=max_dy))
    scale = jax.random.uniform(k4, (), minval=scale_range[0],
                               maxval=scale_range[1])
    shear_x = jax.random.uniform(k5, (), minval=shear[0], maxval=shear[1])
    shear_y = jnp.float32(0.0)   # 2-element shear range -> x-shear only
    return angle, (tx, ty), scale, (shear_x, shear_y)


def _inverse_affine_matrix(angle, translate, scale, shear):
    rot = jnp.deg2rad(angle)
    sx = jnp.deg2rad(shear[0])
    sy = jnp.deg2rad(shear[1])
    tx, ty = translate
    a = jnp.cos(rot - sy) / jnp.cos(sy)
    b = -jnp.cos(rot - sy) * jnp.tan(sx) / jnp.cos(sy) - jnp.sin(rot)
    c = jnp.sin(rot - sy) / jnp.cos(sy)
    d = -jnp.sin(rot - sy) * jnp.tan(sx) / jnp.cos(sy) + jnp.cos(rot)
    m00 = d / scale
    m01 = -b / scale
    m10 = -c / scale
    m11 = a / scale
    # RSS^-1 * T^-1 (center term vanishes since center = image center)
    m02 = m00 * (-tx) + m01 * (-ty)
    m12 = m10 * (-tx) + m11 * (-ty)
    return jnp.stack([m00, m01, m02, m10, m11, m12]).astype(jnp.float32)


def twin_augmentation(x, key, *, degrees=30.0, translate=(0.2, 0.2),
                      scale=(0.9, 1.1), shear=(-3.0, 3.0)):
    """Forward of TwinAugmentation: two independently sampled affine warps.

    x : (B, C, H, W) NCHW (same as the PyTorch module input).
    Returns (x1, x2), each (B, C, H, W).
    """
    B, C, H, W = x.shape
    BC, HW = B * C, H * W
    HW_pad = _round_up(HW, 128)               # lane-dense pixel axis
    row_tile = min(128, _round_up(BC, 8))     # full MXU M-dim when BC is large
    BC_pad = _round_up(BC, row_tile)

    img = x.reshape(BC, HW).astype(jnp.float32)
    img = jnp.pad(img, ((0, BC_pad - BC), (0, HW_pad - HW)))

    # Static centered output-pixel coordinates (computed once, passed in);
    # padded tail is NaN so it can never map in-bounds -> zero fill.
    pix = jnp.arange(HW_pad)
    jj = (pix % W).astype(jnp.float32) - (W - 1) * 0.5
    ii = (pix // W).astype(jnp.float32) - (H - 1) * 0.5
    valid = pix < HW
    coords = jnp.stack([jnp.where(valid, jj, jnp.nan),
                        jnp.where(valid, ii, jnp.nan)], axis=0)  # (2, HW_pad)

    k1, k2 = jax.random.split(key)
    mats = []
    for k in (k1, k2):
        angle, trans, sc, sh = _sample_affine_params(
            k, H, W, degrees, translate, scale, shear)
        mats.append(_inverse_affine_matrix(angle, trans, sc, sh))
    mats = jnp.concatenate(mats)   # (12,) f32

    out1, out2 = _twin_affine_warp(mats, coords, img, H=H, W=W, HW_pad=HW_pad,
                                   BC_pad=BC_pad, row_tile=row_tile)

    def finalize(o):
        return o[:BC, :HW].reshape(B, C, H, W).astype(x.dtype)

    return finalize(out1), finalize(out2)


if __name__ == "__main__":
    key = jax.random.PRNGKey(0)
    kx, kaug = jax.random.split(key)
    x = jax.random.normal(kx, (2, 4, 16, 16), dtype=jnp.float32)  # NCHW

    x1, x2 = twin_augmentation(x, kaug)
    jax.block_until_ready(x1)
    jax.block_until_ready(x2)

    assert x1.shape == x.shape and x2.shape == x.shape
    assert x1.dtype == x.dtype and x2.dtype == x.dtype
    print("KERNEL_OK")
</pallas_src>

<mosaic_0001>
module attributes {stable_mosaic.version = 11 : i64} {
  func.func @_twin_warp_kernel(%arg0: i32, %arg1: memref<12xf32, #tpu.memory_space<smem>>, %arg2: memref<2x256xf32, #tpu.memory_space<vmem>>, %arg3: memref<8x256xf32, #tpu.memory_space<vmem>>, %arg4: memref<8x256xf32, #tpu.memory_space<vmem>>, %arg5: memref<8x256xf32, #tpu.memory_space<vmem>>, %arg6: memref<256x256xf32, #tpu.memory_space<vmem>>, %arg7: memref<256x256xf32, #tpu.memory_space<vmem>>) attributes {dimension_semantics = [#tpu.dimension_semantics<arbitrary>], iteration_bounds = array<i64: 1>, scalar_prefetch = 0 : i64, scratch_operands = 2 : i64, tpu.core_type = #tpu.core_type<tc>, window_params = [{transform_indices = @transform_0, window_bounds = array<i64: 12>}, {pipeline_mode = #tpu.pipeline_mode<synchronous>, transform_indices = @transform_1, window_bounds = array<i64: 2, 256>}, {transform_indices = @transform_2, window_bounds = array<i64: 8, 256>}, {transform_indices = @transform_3, window_bounds = array<i64: 8, 256>}, {transform_indices = @transform_4, window_bounds = array<i64: 8, 256>}]} {
    %c0_i32 = arith.constant 0 : i32
    %0 = arith.cmpi eq, %arg0, %c0_i32 : i32
    %1 = arith.extui %0 : i1 to i32
    %c0_i32_0 = arith.constant 0 : i32
    %2 = arith.cmpi ne, %1, %c0_i32_0 : i32
    scf.if %2 {
      %c0_11 = arith.constant 0 : index
      %c0_12 = arith.constant 0 : index
      %10 = vector.load %arg2[%c0_11, %c0_12] : memref<2x256xf32, #tpu.memory_space<vmem>>, vector<1x256xf32>
      %c1 = arith.constant 1 : index
      %c0_13 = arith.constant 0 : index
      %11 = vector.load %arg2[%c1, %c0_13] : memref<2x256xf32, #tpu.memory_space<vmem>>, vector<1x256xf32>
      %12 = tpu.iota {dimensions = array<i32: 0>} : vector<256x1xi32>
      %c0_14 = arith.constant 0 : index
      %13 = memref.load %arg1[%c0_14] : memref<12xf32, #tpu.memory_space<smem>>
      %c1_15 = arith.constant 1 : index
      %14 = memref.load %arg1[%c1_15] : memref<12xf32, #tpu.memory_space<smem>>
      %c2 = arith.constant 2 : index
      %15 = memref.load %arg1[%c2] : memref<12xf32, #tpu.memory_space<smem>>
      %c3 = arith.constant 3 : index
      %16 = memref.load %arg1[%c3] : memref<12xf32, #tpu.memory_space<smem>>
      %c4 = arith.constant 4 : index
      %17 = memref.load %arg1[%c4] : memref<12xf32, #tpu.memory_space<smem>>
      %c5 = arith.constant 5 : index
      %18 = memref.load %arg1[%c5] : memref<12xf32, #tpu.memory_space<smem>>
      %19 = vector.broadcast %13 : f32 to vector<1x256xf32>
      %20 = arith.mulf %19, %10 : vector<1x256xf32>
      %21 = vector.broadcast %14 : f32 to vector<1x256xf32>
      %22 = arith.mulf %21, %11 : vector<1x256xf32>
      %23 = arith.addf %20, %22 : vector<1x256xf32>
      %24 = vector.broadcast %15 : f32 to vector<1x256xf32>
      %25 = arith.addf %23, %24 : vector<1x256xf32>
      %cst_16 = arith.constant 7.500000e+00 : f32
      %26 = vector.broadcast %cst_16 : f32 to vector<1x256xf32>
      %27 = arith.addf %25, %26 : vector<1x256xf32>
      %28 = vector.broadcast %16 : f32 to vector<1x256xf32>
      %29 = arith.mulf %28, %10 : vector<1x256xf32>
      %30 = vector.broadcast %17 : f32 to vector<1x256xf32>
      %31 = arith.mulf %30, %11 : vector<1x256xf32>
      %32 = arith.addf %29, %31 : vector<1x256xf32>
      %33 = vector.broadcast %18 : f32 to vector<1x256xf32>
      %34 = arith.addf %32, %33 : vector<1x256xf32>
      %cst_17 = arith.constant 7.500000e+00 : f32
      %35 = vector.broadcast %cst_17 : f32 to vector<1x256xf32>
      %36 = arith.addf %34, %35 : vector<1x256xf32>
      %37 = math.roundeven %27 : vector<1x256xf32>
      %38 = math.roundeven %36 : vector<1x256xf32>
      %cst_18 = arith.constant 0.000000e+00 : f32
      %39 = vector.broadcast %cst_18 : f32 to vector<1x256xf32>
      %40 = arith.cmpf oge, %37, %39 : vector<1x256xf32>
      %cst_19 = arith.constant 1.500000e+01 : f32
      %41 = vector.broadcast %cst_19 : f32 to vector<1x256xf32>
      %42 = arith.cmpf ole, %37, %41 : vector<1x256xf32>
      %43 = arith.andi %40, %42 : vector<1x256xi1>
      %cst_20 = arith.constant 0.000000e+00 : f32
      %44 = vector.broadcast %cst_20 : f32 to vector<1x256xf32>
      %45 = arith.cmpf oge, %38, %44 : vector<1x256xf32>
      %46 = arith.andi %43, %45 : vector<1x256xi1>
      %cst_21 = arith.constant 1.500000e+01 : f32
      %47 = vector.broadcast %cst_21 : f32 to vector<1x256xf32>
      %48 = arith.cmpf ole, %38, %47 : vector<1x256xf32>
      %49 = arith.andi %46, %48 : vector<1x256xi1>
      %50 = arith.fptosi %37 : vector<1x256xf32> to vector<1x256xi32>
      %c0_i32_22 = arith.constant 0 : i32
      %c15_i32 = arith.constant 15 : i32
      %51 = vector.broadcast %c0_i32_22 : i32 to vector<1x256xi32>
      %52 = arith.maxsi %51, %50 : vector<1x256xi32>
      %53 = vector.broadcast %c15_i32 : i32 to vector<1x256xi32>
      %54 = arith.minsi %53, %52 : vector<1x256xi32>
      %55 = arith.fptosi %38 : vector<1x256xf32> to vector<1x256xi32>
      %c0_i32_23 = arith.constant 0 : i32
      %c15_i32_24 = arith.constant 15 : i32
      %56 = vector.broadcast %c0_i32_23 : i32 to vector<1x256xi32>
      %57 = arith.maxsi %56, %55 : vector<1x256xi32>
      %58 = vector.broadcast %c15_i32_24 : i32 to vector<1x256xi32>
      %59 = arith.minsi %58, %57 : vector<1x256xi32>
      %c16_i32 = arith.constant 16 : i32
      %60 = vector.broadcast %c16_i32 : i32 to vector<1x256xi32>
      %61 = arith.muli %59, %60 : vector<1x256xi32>
      %62 = arith.addi %61, %54 : vector<1x256xi32>
      %63 = vector.broadcast %12 : vector<256x1xi32> to vector<256x256xi32>
      %64 = vector.broadcast %62 : vector<1x256xi32> to vector<256x256xi32>
      %65 = arith.cmpi eq, %63, %64 : vector<256x256xi32>
      %66 = vector.broadcast %49 : vector<1x256xi1> to vector<256x256xi1>
      %67 = arith.andi %65, %66 : vector<256x256xi1>
      %cst_25 = arith.constant 1.000000e+00 : f32
      %cst_26 = arith.constant 0.000000e+00 : f32
      %68 = vector.broadcast %cst_25 : f32 to vector<256x256xf32>
      %69 = vector.broadcast %cst_26 : f32 to vector<256x256xf32>
      %70 = arith.select %67, %68, %69 : vector<256x256xi1>, vector<256x256xf32>
      %c0_27 = arith.constant 0 : index
      %c0_28 = arith.constant 0 : index
      %71 = vector.load %arg6[%c0_27, %c0_28] : memref<256x256xf32, #tpu.memory_space<vmem>>, vector<256x256xf32>
      tpu.vector_store %arg6[%c0_27, %c0_28], %70 {strides = array<i32>} : memref<256x256xf32, #tpu.memory_space<vmem>>, vector<256x256xf32>,
      %c6 = arith.constant 6 : index
      %72 = memref.load %arg1[%c6] : memref<12xf32, #tpu.memory_space<smem>>
      %c7 = arith.constant 7 : index
      %73 = memref.load %arg1[%c7] : memref<12xf32, #tpu.memory_space<smem>>
      %c8 = arith.constant 8 : index
      %74 = memref.load %arg1[%c8] : memref<12xf32, #tpu.memory_space<smem>>
      %c9 = arith.constant 9 : index
      %75 = memref.load %arg1[%c9] : memref<12xf32, #tpu.memory_space<smem>>
      %c10 = arith.constant 10 : index
      %76 = memref.load %arg1[%c10] : memref<12xf32, #tpu.memory_space<smem>>
      %c11 = arith.constant 11 : index
      %77 = memref.load %arg1[%c11] : memref<12xf32, #tpu.memory_space<smem>>
      %78 = vector.broadcast %72 : f32 to vector<1x256xf32>
      %79 = arith.mulf %78, %10 : vector<1x256xf32>
      %80 = vector.broadcast %73 : f32 to vector<1x256xf32>
      %81 = arith.mulf %80, %11 : vector<1x256xf32>
      %82 = arith.addf %79, %81 : vector<1x256xf32>
      %83 = vector.broadcast %74 : f32 to vector<1x256xf32>
      %84 = arith.addf %82, %83 : vector<1x256xf32>
      %cst_29 = arith.constant 7.500000e+00 : f32
      %85 = vector.broadcast %cst_29 : f32 to vector<1x256xf32>
      %86 = arith.addf %84, %85 : vector<1x256xf32>
      %87 = vector.broadcast %75 : f32 to vector<1x256xf32>
      %88 = arith.mulf %87, %10 : vector<1x256xf32>
      %89 = vector.broadcast %76 : f32 to vector<1x256xf32>
      %90 = arith.mulf %89, %11 : vector<1x256xf32>
      %91 = arith.addf %88, %90 : vector<1x256xf32>
      %92 = vector.broadcast %77 : f32 to vector<1x256xf32>
      %93 = arith.addf %91, %92 : vector<1x256xf32>
      %cst_30 = arith.constant 7.500000e+00 : f32
      %94 = vector.broadcast %cst_30 : f32 to vector<1x256xf32>
      %95 = arith.addf %93, %94 : vector<1x256xf32>
      %96 = math.roundeven %86 : vector<1x256xf32>
      %97 = math.roundeven %95 : vector<1x256xf32>
      %cst_31 = arith.constant 0.000000e+00 : f32
      %98 = vector.broadcast %cst_31 : f32 to vector<1x256xf32>
      %99 = arith.cmpf oge, %96, %98 : vector<1x256xf32>
      %cst_32 = arith.constant 1.500000e+01 : f32
      %100 = vector.broadcast %cst_32 : f32 to vector<1x256xf32>
      %101 = arith.cmpf ole, %96, %100 : vector<1x256xf32>
      %102 = arith.andi %99, %101 : vector<1x256xi1>
      %cst_33 = arith.constant 0.000000e+00 : f32
      %103 = vector.broadcast %cst_33 : f32 to vector<1x256xf32>
      %104 = arith.cmpf oge, %97, %103 : vector<1x256xf32>
      %105 = arith.andi %102, %104 : vector<1x256xi1>
      %cst_34 = arith.constant 1.500000e+01 : f32
      %106 = vector.broadcast %cst_34 : f32 to vector<1x256xf32>
      %107 = arith.cmpf ole, %97, %106 : vector<1x256xf32>
      %108 = arith.andi %105, %107 : vector<1x256xi1>
      %109 = arith.fptosi %96 : vector<1x256xf32> to vector<1x256xi32>
      %c0_i32_35 = arith.constant 0 : i32
      %c15_i32_36 = arith.constant 15 : i32
      %110 = vector.broadcast %c0_i32_35 : i32 to vector<1x256xi32>
      %111 = arith.maxsi %110, %109 : vector<1x256xi32>
      %112 = vector.broadcast %c15_i32_36 : i32 to vector<1x256xi32>
      %113 = arith.minsi %112, %111 : vector<1x256xi32>
      %114 = arith.fptosi %97 : vector<1x256xf32> to vector<1x256xi32>
      %c0_i32_37 = arith.constant 0 : i32
      %c15_i32_38 = arith.constant 15 : i32
      %115 = vector.broadcast %c0_i32_37 : i32 to vector<1x256xi32>
      %116 = arith.maxsi %115, %114 : vector<1x256xi32>
      %117 = vector.broadcast %c15_i32_38 : i32 to vector<1x256xi32>
      %118 = arith.minsi %117, %116 : vector<1x256xi32>
      %c16_i32_39 = arith.constant 16 : i32
      %119 = vector.broadcast %c16_i32_39 : i32 to vector<1x256xi32>
      %120 = arith.muli %118, %119 : vector<1x256xi32>
      %121 = arith.addi %120, %113 : vector<1x256xi32>
      %122 = vector.broadcast %12 : vector<256x1xi32> to vector<256x256xi32>
      %123 = vector.broadcast %121 : vector<1x256xi32> to vector<256x256xi32>
      %124 = arith.cmpi eq, %122, %123 : vector<256x256xi32>
      %125 = vector.broadcast %108 : vector<1x256xi1> to vector<256x256xi1>
      %126 = arith.andi %124, %125 : vector<256x256xi1>
      %cst_40 = arith.constant 1.000000e+00 : f32
      %cst_41 = arith.constant 0.000000e+00 : f32
      %127 = vector.broadcast %cst_40 : f32 to vector<256x256xf32>
      %128 = vector.broadcast %cst_41 : f32 to vector<256x256xf32>
      %129 = arith.select %126, %127, %128 : vector<256x256xi1>, vector<256x256xf32>
      %c0_42 = arith.constant 0 : index
      %c0_43 = arith.constant 0 : index
      %130 = vector.load %arg7[%c0_42, %c0_43] : memref<256x256xf32, #tpu.memory_space<vmem>>, vector<256x256xf32>
      tpu.vector_store %arg7[%c0_42, %c0_43], %129 {strides = array<i32>} : memref<256x256xf32, #tpu.memory_space<vmem>>, vector<256x256xf32>,
    } else {
    }
    %c0 = arith.constant 0 : index
    %c0_1 = arith.constant 0 : index
    %3 = vector.load %arg3[%c0, %c0_1] : memref<8x256xf32, #tpu.memory_space<vmem>>, vector<8x256xf32>
    %c0_2 = arith.constant 0 : index
    %c0_3 = arith.constant 0 : index
    %4 = vector.load %arg6[%c0_2, %c0_3] : memref<256x256xf32, #tpu.memory_space<vmem>>, vector<256x256xf32>
    %cst = arith.constant dense<0.000000e+00> : vector<8x256xf32>
    %5 = tpu.matmul %3, %4, %cst {dimension_numbers = #tpu.dot_dimension_numbers<[1], [0], [0], [1], [0, 0, 1, 1], [], []>} : vector<8x256xf32>, vector<256x256xf32>, vector<8x256xf32> -> vector<8x256xf32>
    %c0_4 = arith.constant 0 : index
    %c0_5 = arith.constant 0 : index
    %6 = vector.load %arg4[%c0_4, %c0_5] : memref<8x256xf32, #tpu.memory_space<vmem>>, vector<8x256xf32>
    tpu.vector_store %arg4[%c0_4, %c0_5], %5 {strides = array<i32>} : memref<8x256xf32, #tpu.memory_space<vmem>>, vector<8x256xf32>,
    %c0_6 = arith.constant 0 : index
    %c0_7 = arith.constant 0 : index
    %7 = vector.load %arg7[%c0_6, %c0_7] : memref<256x256xf32, #tpu.memory_space<vmem>>, vector<256x256xf32>
    %cst_8 = arith.constant dense<0.000000e+00> : vector<8x256xf32>
    %8 = tpu.matmul %3, %7, %cst_8 {dimension_numbers = #tpu.dot_dimension_numbers<[1], [0], [0], [1], [0, 0, 1, 1], [], []>} : vector<8x256xf32>, vector<256x256xf32>, vector<8x256xf32> -> vector<8x256xf32>
    %c0_9 = arith.constant 0 : index
    %c0_10 = arith.constant 0 : index
    %9 = vector.load %arg5[%c0_9, %c0_10] : memref<8x256xf32, #tpu.memory_space<vmem>>, vector<8x256xf32>
    tpu.vector_store %arg5[%c0_9, %c0_10], %8 {strides = array<i32>} : memref<8x256xf32, #tpu.memory_space<vmem>>, vector<8x256xf32>,
    return
  }
  func.func @transform_0(%arg0: i32) -> i32 {
    %c0_i32 = arith.constant 0 : i32
    %c0_i32_0 = arith.constant 0 : i32
    return %c0_i32 : i32
  }
  func.func @transform_1(%arg0: i32) -> (i32, i32) {
    %c0_i32 = arith.constant 0 : i32
    %c0_i32_0 = arith.constant 0 : i32
    %c0_i32_1 = arith.constant 0 : i32
    return %c0_i32, %c0_i32_0 : i32, i32
  }
  func.func @transform_2(%arg0: i32) -> (i32, i32) {
    %c0_i32 = arith.constant 0 : i32
    %c0_i32_0 = arith.constant 0 : i32
    return %arg0, %c0_i32 : i32, i32
  }
  func.func @transform_3(%arg0: i32) -> (i32, i32) {
    %c0_i32 = arith.constant 0 : i32
    %c0_i32_0 = arith.constant 0 : i32
    return %arg0, %c0_i32 : i32, i32
  }
  func.func @transform_4(%arg0: i32) -> (i32, i32) {
    %c0_i32 = arith.constant 0 : i32
    %c0_i32_0 = arith.constant 0 : i32
    return %arg0, %c0_i32 : i32, i32
  }
}

</mosaic_0001>

<bundles_post_ra>
// kernel: tpu_custom_call.1
= control target key start
LH: loop header
LB: loop body
LE: loop exit
PB: predicated region body
PF: predicated region fallthrough
CT: control target
= control target key end

     0   :  { %10 = vsyncpa [#allocation7], 0  ;;  %s2068_s0 = inlined_call_operand.hbm [shape: f32[12], index: 0, kind: input, shape index: {}]   ;;  %s2069_s1 = inlined_call_operand.hbm [shape: f32[2,256], index: 1, kind: input, shape index: {}]   ;;  %s2070_s2 = inlined_call_operand.hbm [shape: f32[8,256], index: 2, kind: input, shape index: {}]   ;;  %s2071_s3 = inlined_call_operand.hbm [shape: f32[8,256], index: 3, kind: output, shape index: {0}]   ;;  %s2072_s4 = inlined_call_operand.hbm [shape: f32[8,256], index: 4, kind: output, shape index: {1}]  }
   0x1   :  { %11 = vsyncpa [#allocation5], 0 }
   0x2   :  { %12 = vsyncpa [#allocation10], 0 }
   0x3   :  { %13 = vsyncpa [#allocation6], 0 }
   0x4   :  { %14 = vsyncpa [#allocation13], 0  ;;  %s1326_s17 = scalar_lea.hbm %s2068_s0, 16 }
   0x5   :  { %p1327_p0 = scmp.ne.s32.totalorder %s2068_s0, %s1326_s17  ;;  %p1330_p1 = scmp.lt.u32.totalorder %s1326_s17, %s2068_s0 }
   0x7   :  { %p1332_p2 = pnand %p1330_p1, %p1327_p0 }
   0x9   :  { %1335 = shalt.err (!%p1332_p2)
}
   0xa   :  { %s1434_s22 = smov [#allocation4]   ;;  %s1435_s25 = smov [#allocation8]  }
   0xb   :  { %22 = dma.hbm_to_smem %s2068_s0, 16, %s1434_s22, [#allocation7]  }
   0xc   :  { %s29_s26 = sshll.u32 %s1435_s25, 4  ;;  %s1436_s27 = smov [#allocation9]   ;;  %s30_s26 = int_to_ptr.vmem [resolvable:$true] %s29_s26 }
   0xd   :  { %s39_s28 = sshll.u32 %s1436_s27, 4  ;;  %s1336_s5 = scalar_lea.hbm %s2069_s1, 64  ;;  %s40_s28 = int_to_ptr.vmem [resolvable:$true] %s39_s28 }
   0xe   :  { %p1337_p3 = scmp.ne.s32.totalorder %s2069_s1, %s1336_s5  ;;  %p1340_p4 = scmp.lt.u32.totalorder %s1336_s5, %s2069_s1 }
  0x10   :  { %p1342_p5 = pnand %p1340_p4, %p1337_p3 }
  0x12   :  { %1345 = shalt.err (!%p1342_p5)
}
  0x13   :  { %s1346_s0 = scalar_lea.vmem %s30_s26, 64  ;;  %p1351_p7 = scmp.lt.s32.totalorder %s30_s26, %s30_s26 }
  0x14   :  { %p1347_p6 = scmp.ne.s32.totalorder %s30_s26, %s1346_s0  ;;  %p1352_p8 = scmp.lt.s32.totalorder %s1346_s0, %s1346_s0 }
  0x16   :  { %p1353_p9 = por %p1352_p8, %p1351_p7 }
  0x18   :  { %p1354_p10 = pnand %p1353_p9, %p1347_p6 }
  0x1a   :  { %1357 = shalt.err (!%p1354_p10)
}
  0x1b   :  { %32 = dma.hbm_to_vmem [thread:$0]  %s2069_s1, 64, %s30_s26, [#allocation5]  }
  0x1c   :  { %s1358_s14 = scalar_lea.hbm %s2070_s2, 256 }
  0x1d   :  { %p1359_p11 = scmp.ne.s32.totalorder %s2070_s2, %s1358_s14  ;;  %p1362_p12 = scmp.lt.u32.totalorder %s1358_s14, %s2070_s2 }
  0x1f   :  { %p1364_p13 = pnand %p1362_p12, %p1359_p11 }
  0x21   :  { %1367 = shalt.err (!%p1364_p13)
}
  0x22   :  { %s1368_s19 = scalar_lea.vmem %s40_s28, 256  ;;  %p1373_p1 = scmp.lt.s32.totalorder %s40_s28, %s40_s28 }
  0x23   :  { %p1369_p0 = scmp.ne.s32.totalorder %s40_s28, %s1368_s19  ;;  %p1374_p2 = scmp.lt.s32.totalorder %s1368_s19, %s1368_s19 }
  0x25   :  { %p1375_p3 = por %p1374_p2, %p1373_p1 }
  0x27   :  { %p1376_p4 = pnand %p1375_p3, %p1369_p0 }
  0x29   :  { %1379 = shalt.err (!%p1376_p4)
}
  0x2a   :  { %42 = dma.hbm_to_vmem [thread:$0]  %s2070_s2, 256, %s40_s28, [#allocation10]  }
  0x2b   :  { %1424 = dma.done.wait [#allocation7], 16  }
  0x2c   :  { %1425 = vsyncadd [#allocation7], 4294967280 }
  0x2d   :  { %1426 = dma.done.wait [#allocation5], 64  }
  0x2e   :  { %1427 = vsyncadd [#allocation5], 4294967232 }
  0x2f   :  { %1428 = dma.done.wait [#allocation10], 256  }
  0x30   :  { %1429 = vsyncadd [#allocation10], 4294967040 }
  0x31   :  { %52 = sfence }
  0x32   :  { %s93_s21 = sld [smem:[#allocation4]]  ;;  %s1036_s22 = sld [smem:[#allocation4 + $0x1]]  ;;  %v57_v0 = vld [vmem:[#allocation8] ss:$2 sm:$0x3]  ;;  %v60_v4 = vlaneseq  ;;  %v1437_v49 = vmov 0  }
  0x33   :  { %s1502_s23 = sld [smem:[#allocation4 + $0x2]]  ;;  %s1038_s24 = sld [smem:[#allocation4 + $0x3]]  ;;  %v59_v1 = vld [vmem:[#allocation8 + $0x1] ss:$2 sm:$0x3] }
  0x34   :  { %s1039_s25 = sld [smem:[#allocation4 + $0x4]]  ;;  %s1504_s26 = sld [smem:[#allocation4 + $0x5]]  ;;  %v1514_v31 = vshrl.u32 %v60_v4, 7 }
  0x35   :  { %s1041_s27 = sld [smem:[#allocation4 + $0x6]]  ;;  %s1042_s2 = sld [smem:[#allocation4 + $0x7]] }
  0x36   :  { %s1506_s28 = sld [smem:[#allocation4 + $0x8]]  ;;  %s1044_s29 = sld [smem:[#allocation4 + $0x9]]  ;;  %v142_v43 = vsub.s32 1, %v1514_v31  ;;  %v62_v57 = vadd.s32 8, %v1514_v31  ;;  %v138_v62 = vsub.s32 0, %v1514_v31  ;;  %v90_v42 = vadd.s32 232, %v1514_v31 }
  0x37   :  { %s1045_s30 = sld [smem:[#allocation4 + $0xa]]  ;;  %s1508_s5 = sld [smem:[#allocation4 + $0xb]] }
  0x38   :  { %v99_v2 = vstv %s93_s21  ;;  %v101_v3 = vstv %s1036_s22  ;;  %s1439_s6 = smov [#allocation11]   ;;  %s1440_s8 = smov [#allocation12]  }
  0x39   :  { %v100_v5 = vmul.f32 %v99_v2, %v57_v0  ;;  %v102_v6 = vmul.f32 %v101_v3, %v59_v1  ;;  %v107_v7 = vstv %s1038_s24  ;;  %v104_v8 = vstv %s1502_s23  ;;  %s1011_s7 = sshll.u32 %s1439_s6, 4  ;;  %s1021_s9 = sshll.u32 %s1440_s8, 4  ;;  %s1012_s7 = int_to_ptr.vmem [resolvable:$true] %s1011_s7  ;;  %s2037_s9 = int_to_ptr.vmem [resolvable:$true] %s1021_s9 }
  0x3a   :  { %v108_v9 = vmul.f32 %v107_v7, %v57_v0  ;;  %v109_v10 = vstv %s1039_s25  ;;  %v112_v11 = vstv %s1504_s26  ;;  %s1380_s0 = scalar_lea.vmem %s1012_s7, 256  ;;  %p1385_p6 = scmp.lt.s32.totalorder %s1012_s7, %s1012_s7 }
  0x3b   :  { %v103_v12 = vadd.f32 %v102_v6, %v100_v5  ;;  %v110_v13 = vmul.f32 %v109_v10, %v59_v1  ;;  %v417_v14 = vstv %s1041_s27  ;;  %v419_v15 = vstv %s1042_s2  ;;  %p1381_p5 = scmp.ne.s32.totalorder %s1012_s7, %s1380_s0  ;;  %p1386_p7 = scmp.lt.s32.totalorder %s1380_s0, %s1380_s0 }
  0x3c   :  { %v418_v16 = vmul.f32 %v417_v14, %v57_v0  ;;  %v420_v17 = vmul.f32 %v419_v15, %v59_v1  ;;  %v422_v18 = vstv %s1506_s28  ;;  %v425_v19 = vstv %s1044_s29 }
  0x3d   :  { %v105_v20 = vadd.f32 %v104_v8, %v103_v12  ;;  %v111_v21 = vadd.f32 %v110_v13, %v108_v9  ;;  %v426_v22 = vmul.f32 %v425_v19, %v57_v0  ;;  %v427_v23 = vstv %s1045_s30  ;;  %p1387_p8 = por %p1386_p7, %p1385_p6 }
  0x3e   :  { %v421_v24 = vadd.f32 %v420_v17, %v418_v16  ;;  %v428_v25 = vmul.f32 %v427_v23, %v59_v1  ;;  %v430_v28 = vstv %s1508_s5  ;;  %v1438_v10 = vmov 1.0|1.0   ;;  %v730_v23 = vld [vmem:[#allocation9 + $0x8] sm:$0xff] }
  0x3f   :  { %v106_v26 = vadd.f32 7.5, %v105_v20  ;;  %v113_v27 = vadd.f32 %v112_v11, %v111_v21  ;;  %v63_v12 = vadd.s32 16, %v1514_v31  ;;  %v64_v14 = vadd.s32 24, %v1514_v31  ;;  %859 = vmatprep.mubr.f32.mxu0 %v730_v23  ;;  %996 = vmatprep.mubr.f32.mxu1 %v730_v23  ;;  %p1388_p9 = pnand %p1387_p8, %p1381_p5 }
  0x40   :  { %v423_v29 = vadd.f32 %v422_v18, %v421_v24  ;;  %v429_v30 = vadd.f32 %v428_v25, %v426_v22  ;;  %v65_v15 = vadd.s32 32, %v1514_v31  ;;  %v66_v16 = vadd.s32 40, %v1514_v31 }
  0x41   :  { %v114_v32 = vadd.f32 7.5, %v113_v27  ;;  %v1303_v33 = vround.rtne.f32 %v106_v26  ;;  %v1307_v34 = vcvt.f32.s32 %v106_v26  ;;  %v67_v17 = vadd.s32 48, %v1514_v31 }
  0x42   :  { %v424_v35 = vadd.f32 7.5, %v423_v29  ;;  %v431_v36 = vadd.f32 %v430_v28, %v429_v30  ;;  %v68_v18 = vadd.s32 56, %v1514_v31  ;;  %v69_v19 = vadd.s32 64, %v1514_v31 }
  0x43   :  { %v1304_v37 = vround.rtne.f32 %v114_v32  ;;  %vm117_vm0 = vcmp.ge.f32.partialorder %v1303_v33, 0.0  ;;  %vm118_vm1 = vcmp.le.f32.partialorder %v1303_v33, 15.0  ;;  %vm125_vm2 = vcmp.gt.s32.totalorder %v1307_v34, 0 }
  0x44   :  { %vm119_vm3 = vmand %vm117_vm0, %vm118_vm1  ;;  %v126_v38 = vsel %vm125_vm2, %v1307_v34, 0  ;;  %v1310_v39 = vcvt.f32.s32 %v114_v32  ;;  %v432_v40 = vadd.f32 7.5, %v431_v36  ;;  %v1311_v41 = vround.rtne.f32 %v424_v35 }
  0x45   :  { %vm120_vm4 = vcmp.ge.f32.partialorder %v1304_v37, 0.0  ;;  %vm1516_vm5 = vcmp.le.f32.partialorder %v1304_v37, 15.0  ;;  %v1315_v44 = vcvt.f32.s32 %v424_v35  ;;  %vm127_vm7 = vcmp.lt.s32.totalorder %v126_v38, 15 }
  0x46   :  { %vm121_vm6 = vmand %vm119_vm3, %vm120_vm4  ;;  %vm130_vm8 = vcmp.gt.s32.totalorder %v1310_v39, 0  ;;  %v1312_v45 = vround.rtne.f32 %v432_v40  ;;  %vm1521_vm9 = vcmp.ge.f32.partialorder %v1311_v41, 0.0  ;;  %vm436_vm11 = vcmp.le.f32.partialorder %v1311_v41, 15.0 }
  0x47   :  { %vm123_vm10 = vmand %vm121_vm6, %vm1516_vm5  ;;  %v131_v47 = vsel %vm130_vm8, %v1310_v39, 0  ;;  %vm443_vm12 = vcmp.gt.s32.totalorder %v1315_v44, 0  ;;  %v1318_v48 = vcvt.f32.s32 %v432_v40  ;;  %v128_v51 = vsel %vm127_vm7, %v126_v38, 15 }
  0x48   :  { %vm132_vm13 = vcmp.lt.s32.totalorder %v131_v47, 15  ;;  %v208_v50 = vsel %vm123_vm10, 1, %v1437_v49  ;;  %vm437_vm14 = vmand %vm1521_vm9, %vm436_vm11  ;;  %vm438_vm15 = vcmp.ge.f32.partialorder %v1312_v45, 0.0  ;;  %vm440_vm0 = vcmp.le.f32.partialorder %v1312_v45, 15.0 }
  0x49   :  { %v133_v52 = vsel %vm132_vm13, %v131_v47, 15  ;;  %vm439_vm1 = vmand %vm437_vm14, %vm438_vm15  ;;  %v444_v53 = vsel %vm443_vm12, %v1315_v44, 0  ;;  %vm448_vm2 = vcmp.gt.s32.totalorder %v1318_v48, 0  ;;  %v216_v55 = vrot.slane %v208_v50, %v142_v43 }
  0x4a   :  { %v134_v54 = vmul.u32 16, %v133_v52  ;;  %vm441_vm3 = vmand %vm439_vm1, %vm440_vm0  ;;  %vm445_vm4 = vcmp.lt.s32.totalorder %v444_v53, 15  ;;  %v449_v56 = vsel %vm448_vm2, %v1318_v48, 0  ;;  %v212_v5 = vrot.slane %v208_v50, %v138_v62 }
  0x4b   :  { %vm450_vm5 = vcmp.lt.s32.totalorder %v449_v56, 15  ;;  %v526_v58 = vsel %vm441_vm3, 1, %v1437_v49  ;;  %v446_v60 = vsel %vm445_vm4, %v444_v53, 15  ;;  %vm1533_vm6 = vcmp.eq.s32.totalorder %v216_v55, 1 }
  0x4c   :  { %v135_v59 = vadd.s32 %v134_v54, %v128_v51  ;;  %v451_v61 = vsel %vm450_vm5, %v449_v56, 15  ;;  %v534_v0 = vrot.slane %v526_v58, %v142_v43  ;;  %v530_v9 = vrot.slane %v526_v58, %v138_v62 }
  0x4d   :  { %v452_v63 = vmul.u32 16, %v451_v61  ;;  %vm1562_vm1 = vcmp.eq.s32.totalorder %v212_v5, 1  ;;  %v70_v20 = vadd.s32 72, %v1514_v31  ;;  %v71_v21 = vadd.s32 80, %v1514_v31 }
  0x4e   :  { %v1531_v1 = vrot.slane %v135_v59, %v142_v43  ;;  %v1540_v4 = vrot.slane %v135_v59, %v138_v62  ;;  %vm1546_vm10 = vcmp.eq.s32.totalorder %v534_v0, 1  ;;  %v72_v22 = vadd.s32 88, %v1514_v31 }
  0x4f   :  { %v453_v3 = vadd.s32 %v452_v63, %v446_v60  ;;  %v73_v24 = vadd.s32 96, %v1514_v31  ;;  %v74_v25 = vadd.s32 104, %v1514_v31  ;;  %v75_v26 = vadd.s32 112, %v1514_v31 }
  0x50   :  { %vm145_vm7 = vcmp.eq.s32.totalorder %v1514_v31, %v1531_v1  ;;  %vm147_vm8 = vcmp.eq.s32.totalorder %v62_v57, %v1531_v1  ;;  %vm144_vm0 = vcmp.eq.s32.totalorder %v1514_v31, %v1540_v4  ;;  %vm146_vm3 = vcmp.eq.s32.totalorder %v62_v57, %v1540_v4 }
  0x51   :  { %vm220_vm9 = vmand %vm145_vm7, %vm1533_vm6  ;;  %v1544_v6 = vrot.slane %v453_v3, %v142_v43  ;;  %v1555_v8 = vrot.slane %v453_v3, %v138_v62  ;;  %v76_v27 = vadd.s32 120, %v1514_v31  ;;  %v77_v28 = vadd.s32 128, %v1514_v31 }
  0x52   :  { %vm222_vm11 = vmand %vm147_vm8, %vm1533_vm6  ;;  %vm1575_vm8 = vcmp.eq.s32.totalorder %v530_v9, 1  ;;  %v78_v29 = vadd.s32 136, %v1514_v31  ;;  %v79_v30 = vadd.s32 144, %v1514_v31  ;;  %v80_v32 = vadd.s32 152, %v1514_v31 }
  0x53   :  { %vm1175_vm12 = vmpackc.low %vm222_vm11, %vm220_vm9  ;;  %vm463_vm13 = vcmp.eq.s32.totalorder %v1514_v31, %v1544_v6  ;;  %vm465_vm14 = vcmp.eq.s32.totalorder %v62_v57, %v1544_v6  ;;  %vm462_vm7 = vcmp.eq.s32.totalorder %v1514_v31, %v1555_v8  ;;  %vm464_vm11 = vcmp.eq.s32.totalorder %v62_v57, %v1555_v8 }
  0x54   :  { %1176 = vmatprep.subr.msk.bf16.mxu0 %vm1175_vm12, %v1438_v10  ;;  %vm538_vm15 = vmand %vm463_vm13, %vm1546_vm10  ;;  %v81_v33 = vadd.s32 160, %v1514_v31  ;;  %v82_v34 = vadd.s32 168, %v1514_v31  ;;  %v83_v35 = vadd.s32 176, %v1514_v31  ;;  %v84_v36 = vadd.s32 184, %v1514_v31 }
  0x55   :  { %vm540_vm2 = vmand %vm465_vm14, %vm1546_vm10  ;;  %vm149_vm14 = vcmp.eq.s32.totalorder %v63_v12, %v1531_v1  ;;  %v85_v37 = vadd.s32 192, %v1514_v31  ;;  %v86_v38 = vadd.s32 200, %v1514_v31  ;;  %v87_v39 = vadd.s32 208, %v1514_v31 }
  0x56   :  { %vm1239_vm4 = vmpackc.low %vm540_vm2, %vm538_vm15  ;;  %v88_v40 = vadd.s32 216, %v1514_v31  ;;  %v89_v41 = vadd.s32 224, %v1514_v31  ;;  %v91_v43 = vadd.s32 240, %v1514_v31  ;;  %v92_v44 = vadd.s32 248, %v1514_v31  ;;  %v729_v31 = vld [vmem:[#allocation9] sm:$0xff] }
  0x57   :  { %1240 = vmatprep.subr.msk.bf16.mxu1 %vm1239_vm4, %v1438_v10  ;;  %vm219_vm5 = vmand %vm144_vm0, %vm1562_vm1  ;;  %vm151_vm0 = vcmp.eq.s32.totalorder %v64_v14, %v1531_v1  ;;  %vm467_vm4 = vcmp.eq.s32.totalorder %v63_v12, %v1544_v6 }
  0x58   :  { %vm221_vm9 = vmand %vm146_vm3, %vm1562_vm1 }
  0x59   :  { %vm1177_vm12 = vmpackc.low %vm221_vm9, %vm219_vm5 }
  0x5a   :  { %1178 = vmatpush1.bf16.msk.msra.mxu0 %vm1177_vm12, %v1438_v10  ;;  %vm537_vm13 = vmand %vm462_vm7, %vm1575_vm8  ;;  %vm469_vm7 = vcmp.eq.s32.totalorder %v64_v14, %v1544_v6  ;;  %vm148_vm12 = vcmp.eq.s32.totalorder %v63_v12, %v1540_v4 }
  0x5b   :  { %vm539_vm15 = vmand %vm464_vm11, %vm1575_vm8 }
  0x5c   :  { %vm1241_vm2 = vmpackc.low %vm539_vm15, %vm537_vm13 }
  0x5d   :  { %1242 = vmatpush1.bf16.msk.msra.mxu1 %vm1241_vm2, %v1438_v10  ;;  %vm224_vm3 = vmand %vm149_vm14, %vm1533_vm6  ;;  %vm150_vm14 = vcmp.eq.s32.totalorder %v64_v14, %v1540_v4  ;;  %vm466_vm2 = vcmp.eq.s32.totalorder %v63_v12, %v1555_v8 }
  0x5e   :  { %vm226_vm5 = vmand %vm151_vm0, %vm1533_vm6 }
  0x5f   :  { %vm1179_vm9 = vmpackc.low %vm226_vm5, %vm224_vm3 }
  0x60   :  { %1180 = vmatprep.subr.msk.bf16.mxu0 %vm1179_vm9, %v1438_v10  ;;  %vm542_vm11 = vmand %vm467_vm4, %vm1546_vm10  ;;  %vm468_vm4 = vcmp.eq.s32.totalorder %v64_v14, %v1555_v8  ;;  %vm153_vm9 = vcmp.eq.s32.totalorder %v65_v15, %v1531_v1 }
  0x61   :  { %vm544_vm13 = vmand %vm469_vm7, %vm1546_vm10 }
  0x62   :  { %vm1243_vm15 = vmpackc.low %vm544_vm13, %vm542_vm11 }
  0x63   :  { %1244 = vmatprep.subr.msk.bf16.mxu1 %vm1243_vm15, %v1438_v10  ;;  %vm223_vm0 = vmand %vm148_vm12, %vm1562_vm1  ;;  %vm155_vm12 = vcmp.eq.s32.totalorder %v66_v16, %v1531_v1  ;;  %vm471_vm15 = vcmp.eq.s32.totalorder %v65_v15, %v1544_v6 }
  0x64   :  { %vm225_vm3 = vmand %vm150_vm14, %vm1562_vm1 }
  0x65   :  { %vm1181_vm5 = vmpackc.low %vm225_vm3, %vm223_vm0 }
  0x66   :  { %1182 = vmatpush1.bf16.msk.msra.mxu0 %vm1181_vm5, %v1438_v10  ;;  %vm541_vm7 = vmand %vm466_vm2, %vm1575_vm8  ;;  %vm473_vm2 = vcmp.eq.s32.totalorder %v66_v16, %v1544_v6  ;;  %vm152_vm5 = vcmp.eq.s32.totalorder %v65_v15, %v1540_v4 }
  0x67   :  { %vm543_vm11 = vmand %vm468_vm4, %vm1575_vm8 }
  0x68   :  { %vm1245_vm13 = vmpackc.low %vm543_vm11, %vm541_vm7 }
  0x69   :  { %1246 = vmatpush1.bf16.msk.msra.mxu1 %vm1245_vm13, %v1438_v10  ;;  %vm228_vm14 = vmand %vm153_vm9, %vm1533_vm6  ;;  %vm154_vm9 = vcmp.eq.s32.totalorder %v66_v16, %v1540_v4  ;;  %vm470_vm13 = vcmp.eq.s32.totalorder %v65_v15, %v1555_v8 }
  0x6a   :  { %vm230_vm0 = vmand %vm155_vm12, %vm1533_vm6 }
  0x6b   :  { %vm1183_vm3 = vmpackc.low %vm230_vm0, %vm228_vm14 }
  0x6c   :  { %1184 = vmatprep.subr.msk.bf16.mxu0 %vm1183_vm3, %v1438_v10  ;;  %vm546_vm4 = vmand %vm471_vm15, %vm1546_vm10  ;;  %vm472_vm15 = vcmp.eq.s32.totalorder %v66_v16, %v1555_v8  ;;  %vm157_vm3 = vcmp.eq.s32.totalorder %v67_v17, %v1531_v1 }
  0x6d   :  { %vm548_vm7 = vmand %vm473_vm2, %vm1546_vm10 }
  0x6e   :  { %vm1247_vm11 = vmpackc.low %vm548_vm7, %vm546_vm4 }
  0x6f   :  { %1248 = vmatprep.subr.msk.bf16.mxu1 %vm1247_vm11, %v1438_v10  ;;  %vm227_vm12 = vmand %vm152_vm5, %vm1562_vm1  ;;  %vm159_vm5 = vcmp.eq.s32.totalorder %v68_v18, %v1531_v1  ;;  %vm475_vm11 = vcmp.eq.s32.totalorder %v67_v17, %v1544_v6 }
  0x70   :  { %vm229_vm14 = vmand %vm154_vm9, %vm1562_vm1 }
  0x71   :  { %vm1185_vm0 = vmpackc.low %vm229_vm14, %vm227_vm12 }
  0x72   :  { %1186 = vmatpush1.bf16.msk.msra.mxu0 %vm1185_vm0, %v1438_v10  ;;  %vm545_vm2 = vmand %vm470_vm13, %vm1575_vm8  ;;  %vm477_vm13 = vcmp.eq.s32.totalorder %v68_v18, %v1544_v6  ;;  %vm156_vm0 = vcmp.eq.s32.totalorder %v67_v17, %v1540_v4 }
  0x73   :  { %vm547_vm4 = vmand %vm472_vm15, %vm1575_vm8 }
  0x74   :  { %vm1249_vm7 = vmpackc.low %vm547_vm4, %vm545_vm2 }
  0x75   :  { %1250 = vmatpush1.bf16.msk.msra.mxu1 %vm1249_vm7, %v1438_v10  ;;  %vm232_vm9 = vmand %vm157_vm3, %vm1533_vm6  ;;  %vm158_vm3 = vcmp.eq.s32.totalorder %v68_v18, %v1540_v4  ;;  %vm474_vm7 = vcmp.eq.s32.totalorder %v67_v17, %v1555_v8 }
  0x76   :  { %vm234_vm12 = vmand %vm159_vm5, %vm1533_vm6 }
  0x77   :  { %vm1187_vm14 = vmpackc.low %vm234_vm12, %vm232_vm9 }
  0x78   :  { %1188 = vmatprep.subr.msk.bf16.mxu0 %vm1187_vm14, %v1438_v10  ;;  %vm550_vm15 = vmand %vm475_vm11, %vm1546_vm10  ;;  %vm476_vm11 = vcmp.eq.s32.totalorder %v68_v18, %v1555_v8  ;;  %vm161_vm14 = vcmp.eq.s32.totalorder %v69_v19, %v1531_v1 }
  0x79   :  { %vm552_vm2 = vmand %vm477_vm13, %vm1546_vm10 }
  0x7a   :  { %vm1251_vm4 = vmpackc.low %vm552_vm2, %vm550_vm15 }
  0x7b   :  { %1252 = vmatprep.subr.msk.bf16.mxu1 %vm1251_vm4, %v1438_v10  ;;  %vm231_vm5 = vmand %vm156_vm0, %vm1562_vm1  ;;  %vm163_vm0 = vcmp.eq.s32.totalorder %v70_v20, %v1531_v1  ;;  %vm479_vm4 = vcmp.eq.s32.totalorder %v69_v19, %v1544_v6 }
  0x7c   :  { %vm233_vm9 = vmand %vm158_vm3, %vm1562_vm1 }
  0x7d   :  { %vm1189_vm12 = vmpackc.low %vm233_vm9, %vm231_vm5 }
  0x7e   :  { %1190 = vmatpush1.bf16.msk.msra.mxu0 %vm1189_vm12, %v1438_v10  ;;  %vm549_vm13 = vmand %vm474_vm7, %vm1575_vm8  ;;  %vm481_vm7 = vcmp.eq.s32.totalorder %v70_v20, %v1544_v6  ;;  %vm160_vm12 = vcmp.eq.s32.totalorder %v69_v19, %v1540_v4 }
  0x7f   :  { %vm551_vm15 = vmand %vm476_vm11, %vm1575_vm8 }
  0x80   :  { %vm1253_vm2 = vmpackc.low %vm551_vm15, %vm549_vm13 }
  0x81   :  { %1254 = vmatpush1.bf16.msk.msra.mxu1 %vm1253_vm2, %v1438_v10  ;;  %vm236_vm3 = vmand %vm161_vm14, %vm1533_vm6  ;;  %vm162_vm14 = vcmp.eq.s32.totalorder %v70_v20, %v1540_v4  ;;  %vm478_vm2 = vcmp.eq.s32.totalorder %v69_v19, %v1555_v8 }
  0x82   :  { %vm238_vm5 = vmand %vm163_vm0, %vm1533_vm6 }
  0x83   :  { %vm1191_vm9 = vmpackc.low %vm238_vm5, %vm236_vm3 }
  0x84   :  { %1192 = vmatprep.subr.msk.bf16.mxu0 %vm1191_vm9, %v1438_v10  ;;  %vm554_vm11 = vmand %vm479_vm4, %vm1546_vm10  ;;  %vm480_vm4 = vcmp.eq.s32.totalorder %v70_v20, %v1555_v8  ;;  %vm165_vm9 = vcmp.eq.s32.totalorder %v71_v21, %v1531_v1 }
  0x85   :  { %vm556_vm13 = vmand %vm481_vm7, %vm1546_vm10 }
  0x86   :  { %vm1255_vm15 = vmpackc.low %vm556_vm13, %vm554_vm11 }
  0x87   :  { %1256 = vmatprep.subr.msk.bf16.mxu1 %vm1255_vm15, %v1438_v10  ;;  %vm235_vm0 = vmand %vm160_vm12, %vm1562_vm1  ;;  %vm167_vm12 = vcmp.eq.s32.totalorder %v72_v22, %v1531_v1  ;;  %vm483_vm15 = vcmp.eq.s32.totalorder %v71_v21, %v1544_v6 }
  0x88   :  { %vm237_vm3 = vmand %vm162_vm14, %vm1562_vm1 }
  0x89   :  { %vm1193_vm5 = vmpackc.low %vm237_vm3, %vm235_vm0 }
  0x8a   :  { %1194 = vmatpush1.bf16.msk.msra.mxu0 %vm1193_vm5, %v1438_v10  ;;  %vm553_vm7 = vmand %vm478_vm2, %vm1575_vm8  ;;  %vm485_vm2 = vcmp.eq.s32.totalorder %v72_v22, %v1544_v6  ;;  %vm164_vm5 = vcmp.eq.s32.totalorder %v71_v21, %v1540_v4 }
  0x8b   :  { %vm555_vm11 = vmand %vm480_vm4, %vm1575_vm8 }
  0x8c   :  { %vm1257_vm13 = vmpackc.low %vm555_vm11, %vm553_vm7 }
  0x8d   :  { %1258 = vmatpush1.bf16.msk.msra.mxu1 %vm1257_vm13, %v1438_v10  ;;  %vm240_vm14 = vmand %vm165_vm9, %vm1533_vm6  ;;  %vm166_vm9 = vcmp.eq.s32.totalorder %v72_v22, %v1540_v4  ;;  %vm482_vm13 = vcmp.eq.s32.totalorder %v71_v21, %v1555_v8 }
  0x8e   :  { %vm242_vm0 = vmand %vm167_vm12, %vm1533_vm6 }
  0x8f   :  { %vm1195_vm3 = vmpackc.low %vm242_vm0, %vm240_vm14 }
  0x90   :  { %1196 = vmatprep.subr.msk.bf16.mxu0 %vm1195_vm3, %v1438_v10  ;;  %vm558_vm4 = vmand %vm483_vm15, %vm1546_vm10  ;;  %vm484_vm15 = vcmp.eq.s32.totalorder %v72_v22, %v1555_v8  ;;  %vm169_vm3 = vcmp.eq.s32.totalorder %v73_v24, %v1531_v1 }
  0x91   :  { %vm560_vm7 = vmand %vm485_vm2, %vm1546_vm10 }
  0x92   :  { %vm1259_vm11 = vmpackc.low %vm560_vm7, %vm558_vm4 }
  0x93   :  { %1260 = vmatprep.subr.msk.bf16.mxu1 %vm1259_vm11, %v1438_v10  ;;  %vm239_vm12 = vmand %vm164_vm5, %vm1562_vm1  ;;  %vm171_vm5 = vcmp.eq.s32.totalorder %v74_v25, %v1531_v1  ;;  %vm487_vm11 = vcmp.eq.s32.totalorder %v73_v24, %v1544_v6 }
  0x94   :  { %vm241_vm14 = vmand %vm166_vm9, %vm1562_vm1 }
  0x95   :  { %vm1197_vm0 = vmpackc.low %vm241_vm14, %vm239_vm12 }
  0x96   :  { %1198 = vmatpush1.bf16.msk.msra.mxu0 %vm1197_vm0, %v1438_v10  ;;  %vm557_vm2 = vmand %vm482_vm13, %vm1575_vm8  ;;  %vm489_vm13 = vcmp.eq.s32.totalorder %v74_v25, %v1544_v6  ;;  %vm168_vm0 = vcmp.eq.s32.totalorder %v73_v24, %v1540_v4 }
  0x97   :  { %vm559_vm4 = vmand %vm484_vm15, %vm1575_vm8 }
  0x98   :  { %vm1261_vm7 = vmpackc.low %vm559_vm4, %vm557_vm2 }
  0x99   :  { %1262 = vmatpush1.bf16.msk.msra.mxu1 %vm1261_vm7, %v1438_v10  ;;  %vm244_vm9 = vmand %vm169_vm3, %vm1533_vm6  ;;  %vm170_vm3 = vcmp.eq.s32.totalorder %v74_v25, %v1540_v4  ;;  %vm486_vm7 = vcmp.eq.s32.totalorder %v73_v24, %v1555_v8 }
  0x9a   :  { %vm246_vm12 = vmand %vm171_vm5, %vm1533_vm6 }
  0x9b   :  { %vm1199_vm14 = vmpackc.low %vm246_vm12, %vm244_vm9 }
  0x9c   :  { %1200 = vmatprep.subr.msk.bf16.mxu0 %vm1199_vm14, %v1438_v10  ;;  %vm562_vm15 = vmand %vm487_vm11, %vm1546_vm10  ;;  %vm488_vm11 = vcmp.eq.s32.totalorder %v74_v25, %v1555_v8  ;;  %vm173_vm14 = vcmp.eq.s32.totalorder %v75_v26, %v1531_v1 }
  0x9d   :  { %vm564_vm2 = vmand %vm489_vm13, %vm1546_vm10 }
  0x9e   :  { %vm1263_vm4 = vmpackc.low %vm564_vm2, %vm562_vm15 }
  0x9f   :  { %1264 = vmatprep.subr.msk.bf16.mxu1 %vm1263_vm4, %v1438_v10  ;;  %vm243_vm5 = vmand %vm168_vm0, %vm1562_vm1  ;;  %vm175_vm0 = vcmp.eq.s32.totalorder %v76_v27, %v1531_v1  ;;  %vm491_vm4 = vcmp.eq.s32.totalorder %v75_v26, %v1544_v6 }
  0xa0   :  { %vm245_vm9 = vmand %vm170_vm3, %vm1562_vm1 }
  0xa1   :  { %vm1201_vm12 = vmpackc.low %vm245_vm9, %vm243_vm5 }
  0xa2   :  { %1202 = vmatpush1.bf16.msk.msra.mxu0 %vm1201_vm12, %v1438_v10  ;;  %vm561_vm13 = vmand %vm486_vm7, %vm1575_vm8  ;;  %vm493_vm7 = vcmp.eq.s32.totalorder %v76_v27, %v1544_v6  ;;  %vm172_vm12 = vcmp.eq.s32.totalorder %v75_v26, %v1540_v4 }
  0xa3   :  { %vm563_vm15 = vmand %vm488_vm11, %vm1575_vm8 }
  0xa4   :  { %vm1265_vm2 = vmpackc.low %vm563_vm15, %vm561_vm13 }
  0xa5   :  { %1266 = vmatpush1.bf16.msk.msra.mxu1 %vm1265_vm2, %v1438_v10  ;;  %vm248_vm3 = vmand %vm173_vm14, %vm1533_vm6  ;;  %vm174_vm14 = vcmp.eq.s32.totalorder %v76_v27, %v1540_v4  ;;  %vm490_vm2 = vcmp.eq.s32.totalorder %v75_v26, %v1555_v8 }
  0xa6   :  { %vm250_vm5 = vmand %vm175_vm0, %vm1533_vm6 }
  0xa7   :  { %vm1203_vm9 = vmpackc.low %vm250_vm5, %vm248_vm3 }
  0xa8   :  { %1204 = vmatprep.subr.msk.bf16.mxu0 %vm1203_vm9, %v1438_v10  ;;  %vm566_vm11 = vmand %vm491_vm4, %vm1546_vm10  ;;  %vm492_vm4 = vcmp.eq.s32.totalorder %v76_v27, %v1555_v8  ;;  %vm177_vm9 = vcmp.eq.s32.totalorder %v77_v28, %v1531_v1 }
  0xa9   :  { %vm568_vm13 = vmand %vm493_vm7, %vm1546_vm10 }
  0xaa   :  { %vm1267_vm15 = vmpackc.low %vm568_vm13, %vm566_vm11 }
  0xab   :  { %1268 = vmatprep.subr.msk.bf16.mxu1 %vm1267_vm15, %v1438_v10  ;;  %vm247_vm0 = vmand %vm172_vm12, %vm1562_vm1  ;;  %vm179_vm12 = vcmp.eq.s32.totalorder %v78_v29, %v1531_v1  ;;  %vm495_vm15 = vcmp.eq.s32.totalorder %v77_v28, %v1544_v6 }
  0xac   :  { %vm249_vm3 = vmand %vm174_vm14, %vm1562_vm1 }
  0xad   :  { %vm1205_vm5 = vmpackc.low %vm249_vm3, %vm247_vm0 }
  0xae   :  { %1206 = vmatpush1.bf16.msk.msra.mxu0 %vm1205_vm5, %v1438_v10  ;;  %vm565_vm7 = vmand %vm490_vm2, %vm1575_vm8  ;;  %vm497_vm2 = vcmp.eq.s32.totalorder %v78_v29, %v1544_v6  ;;  %vm176_vm5 = vcmp.eq.s32.totalorder %v77_v28, %v1540_v4 }
  0xaf   :  { %vm567_vm11 = vmand %vm492_vm4, %vm1575_vm8 }
  0xb0   :  { %vm1269_vm13 = vmpackc.low %vm567_vm11, %vm565_vm7 }
  0xb1   :  { %1270 = vmatpush1.bf16.msk.msra.mxu1 %vm1269_vm13, %v1438_v10  ;;  %vm252_vm14 = vmand %vm177_vm9, %vm1533_vm6  ;;  %vm178_vm9 = vcmp.eq.s32.totalorder %v78_v29, %v1540_v4  ;;  %vm494_vm13 = vcmp.eq.s32.totalorder %v77_v28, %v1555_v8 }
  0xb2   :  { %vm254_vm0 = vmand %vm179_vm12, %vm1533_vm6 }
  0xb3   :  { %vm1207_vm3 = vmpackc.low %vm254_vm0, %vm252_vm14 }
  0xb4   :  { %1208 = vmatprep.subr.msk.bf16.mxu0 %vm1207_vm3, %v1438_v10  ;;  %vm570_vm4 = vmand %vm495_vm15, %vm1546_vm10  ;;  %vm496_vm15 = vcmp.eq.s32.totalorder %v78_v29, %v1555_v8  ;;  %vm181_vm3 = vcmp.eq.s32.totalorder %v79_v30, %v1531_v1 }
  0xb5   :  { %vm572_vm7 = vmand %vm497_vm2, %vm1546_vm10 }
  0xb6   :  { %vm1271_vm11 = vmpackc.low %vm572_vm7, %vm570_vm4 }
  0xb7   :  { %1272 = vmatprep.subr.msk.bf16.mxu1 %vm1271_vm11, %v1438_v10  ;;  %vm251_vm12 = vmand %vm176_vm5, %vm1562_vm1  ;;  %vm183_vm5 = vcmp.eq.s32.totalorder %v80_v32, %v1531_v1  ;;  %vm499_vm11 = vcmp.eq.s32.totalorder %v79_v30, %v1544_v6 }
  0xb8   :  { %vm253_vm14 = vmand %vm178_vm9, %vm1562_vm1 }
  0xb9   :  { %vm1209_vm0 = vmpackc.low %vm253_vm14, %vm251_vm12 }
  0xba   :  { %1210 = vmatpush1.bf16.msk.msra.mxu0 %vm1209_vm0, %v1438_v10  ;;  %vm569_vm2 = vmand %vm494_vm13, %vm1575_vm8  ;;  %vm501_vm13 = vcmp.eq.s32.totalorder %v80_v32, %v1544_v6  ;;  %vm180_vm0 = vcmp.eq.s32.totalorder %v79_v30, %v1540_v4 }
  0xbb   :  { %vm571_vm4 = vmand %vm496_vm15, %vm1575_vm8 }
  0xbc   :  { %vm1273_vm7 = vmpackc.low %vm571_vm4, %vm569_vm2 }
  0xbd   :  { %1274 = vmatpush1.bf16.msk.msra.mxu1 %vm1273_vm7, %v1438_v10  ;;  %vm256_vm9 = vmand %vm181_vm3, %vm1533_vm6  ;;  %vm182_vm3 = vcmp.eq.s32.totalorder %v80_v32, %v1540_v4  ;;  %vm498_vm7 = vcmp.eq.s32.totalorder %v79_v30, %v1555_v8 }
  0xbe   :  { %vm258_vm12 = vmand %vm183_vm5, %vm1533_vm6 }
  0xbf   :  { %vm1211_vm14 = vmpackc.low %vm258_vm12, %vm256_vm9 }
  0xc0   :  { %1212 = vmatprep.subr.msk.bf16.mxu0 %vm1211_vm14, %v1438_v10  ;;  %vm574_vm15 = vmand %vm499_vm11, %vm1546_vm10  ;;  %vm500_vm11 = vcmp.eq.s32.totalorder %v80_v32, %v1555_v8  ;;  %vm185_vm14 = vcmp.eq.s32.totalorder %v81_v33, %v1531_v1 }
  0xc1   :  { %vm576_vm2 = vmand %vm501_vm13, %vm1546_vm10 }
  0xc2   :  { %vm1275_vm4 = vmpackc.low %vm576_vm2, %vm574_vm15 }
  0xc3   :  { %1276 = vmatprep.subr.msk.bf16.mxu1 %vm1275_vm4, %v1438_v10  ;;  %vm255_vm5 = vmand %vm180_vm0, %vm1562_vm1  ;;  %vm187_vm0 = vcmp.eq.s32.totalorder %v82_v34, %v1531_v1  ;;  %vm503_vm4 = vcmp.eq.s32.totalorder %v81_v33, %v1544_v6 }
  0xc4   :  { %vm257_vm9 = vmand %vm182_vm3, %vm1562_vm1 }
  0xc5   :  { %vm1213_vm12 = vmpackc.low %vm257_vm9, %vm255_vm5 }
  0xc6   :  { %1214 = vmatpush1.bf16.msk.msra.mxu0 %vm1213_vm12, %v1438_v10  ;;  %vm573_vm13 = vmand %vm498_vm7, %vm1575_vm8  ;;  %vm505_vm7 = vcmp.eq.s32.totalorder %v82_v34, %v1544_v6  ;;  %vm184_vm12 = vcmp.eq.s32.totalorder %v81_v33, %v1540_v4 }
  0xc7   :  { %vm575_vm15 = vmand %vm500_vm11, %vm1575_vm8 }
  0xc8   :  { %vm1277_vm2 = vmpackc.low %vm575_vm15, %vm573_vm13 }
  0xc9   :  { %1278 = vmatpush1.bf16.msk.msra.mxu1 %vm1277_vm2, %v1438_v10  ;;  %vm260_vm3 = vmand %vm185_vm14, %vm1533_vm6  ;;  %vm186_vm14 = vcmp.eq.s32.totalorder %v82_v34, %v1540_v4  ;;  %vm502_vm2 = vcmp.eq.s32.totalorder %v81_v33, %v1555_v8 }
  0xca   :  { %vm262_vm5 = vmand %vm187_vm0, %vm1533_vm6 }
  0xcb   :  { %vm1215_vm9 = vmpackc.low %vm262_vm5, %vm260_vm3 }
  0xcc   :  { %1216 = vmatprep.subr.msk.bf16.mxu0 %vm1215_vm9, %v1438_v10  ;;  %vm578_vm11 = vmand %vm503_vm4, %vm1546_vm10  ;;  %vm504_vm4 = vcmp.eq.s32.totalorder %v82_v34, %v1555_v8  ;;  %vm189_vm9 = vcmp.eq.s32.totalorder %v83_v35, %v1531_v1 }
  0xcd   :  { %vm580_vm13 = vmand %vm505_vm7, %vm1546_vm10 }
  0xce   :  { %vm1279_vm15 = vmpackc.low %vm580_vm13, %vm578_vm11 }
  0xcf   :  { %1280 = vmatprep.subr.msk.bf16.mxu1 %vm1279_vm15, %v1438_v10  ;;  %vm259_vm0 = vmand %vm184_vm12, %vm1562_vm1  ;;  %vm191_vm12 = vcmp.eq.s32.totalorder %v84_v36, %v1531_v1  ;;  %vm507_vm15 = vcmp.eq.s32.totalorder %v83_v35, %v1544_v6 }
  0xd0   :  { %vm261_vm3 = vmand %vm186_vm14, %vm1562_vm1 }
  0xd1   :  { %vm1217_vm5 = vmpackc.low %vm261_vm3, %vm259_vm0 }
  0xd2   :  { %1218 = vmatpush1.bf16.msk.msra.mxu0 %vm1217_vm5, %v1438_v10  ;;  %vm577_vm7 = vmand %vm502_vm2, %vm1575_vm8  ;;  %vm509_vm2 = vcmp.eq.s32.totalorder %v84_v36, %v1544_v6  ;;  %vm188_vm5 = vcmp.eq.s32.totalorder %v83_v35, %v1540_v4 }
  0xd3   :  { %vm579_vm11 = vmand %vm504_vm4, %vm1575_vm8 }
  0xd4   :  { %vm1281_vm13 = vmpackc.low %vm579_vm11, %vm577_vm7 }
  0xd5   :  { %1282 = vmatpush1.bf16.msk.msra.mxu1 %vm1281_vm13, %v1438_v10  ;;  %vm264_vm14 = vmand %vm189_vm9, %vm1533_vm6  ;;  %vm190_vm9 = vcmp.eq.s32.totalorder %v84_v36, %v1540_v4  ;;  %vm506_vm13 = vcmp.eq.s32.totalorder %v83_v35, %v1555_v8 }
  0xd6   :  { %vm266_vm0 = vmand %vm191_vm12, %vm1533_vm6 }
  0xd7   :  { %vm1219_vm3 = vmpackc.low %vm266_vm0, %vm264_vm14 }
  0xd8   :  { %1220 = vmatprep.subr.msk.bf16.mxu0 %vm1219_vm3, %v1438_v10  ;;  %vm582_vm4 = vmand %vm507_vm15, %vm1546_vm10  ;;  %vm508_vm15 = vcmp.eq.s32.totalorder %v84_v36, %v1555_v8  ;;  %vm193_vm3 = vcmp.eq.s32.totalorder %v85_v37, %v1531_v1 }
  0xd9   :  { %vm584_vm7 = vmand %vm509_vm2, %vm1546_vm10 }
  0xda   :  { %vm1283_vm11 = vmpackc.low %vm584_vm7, %vm582_vm4 }
  0xdb   :  { %1284 = vmatprep.subr.msk.bf16.mxu1 %vm1283_vm11, %v1438_v10  ;;  %vm263_vm12 = vmand %vm188_vm5, %vm1562_vm1  ;;  %vm195_vm5 = vcmp.eq.s32.totalorder %v86_v38, %v1531_v1  ;;  %vm511_vm11 = vcmp.eq.s32.totalorder %v85_v37, %v1544_v6 }
  0xdc   :  { %vm265_vm14 = vmand %vm190_vm9, %vm1562_vm1 }
  0xdd   :  { %vm1221_vm0 = vmpackc.low %vm265_vm14, %vm263_vm12 }
  0xde   :  { %1222 = vmatpush1.bf16.msk.msra.mxu0 %vm1221_vm0, %v1438_v10  ;;  %vm581_vm2 = vmand %vm506_vm13, %vm1575_vm8  ;;  %vm513_vm13 = vcmp.eq.s32.totalorder %v86_v38, %v1544_v6  ;;  %vm192_vm0 = vcmp.eq.s32.totalorder %v85_v37, %v1540_v4 }
  0xdf   :  { %vm583_vm4 = vmand %vm508_vm15, %vm1575_vm8 }
  0xe0   :  { %vm1285_vm7 = vmpackc.low %vm583_vm4, %vm581_vm2 }
  0xe1   :  { %1286 = vmatpush1.bf16.msk.msra.mxu1 %vm1285_vm7, %v1438_v10  ;;  %vm268_vm9 = vmand %vm193_vm3, %vm1533_vm6  ;;  %vm194_vm3 = vcmp.eq.s32.totalorder %v86_v38, %v1540_v4  ;;  %vm510_vm7 = vcmp.eq.s32.totalorder %v85_v37, %v1555_v8 }
  0xe2   :  { %vm270_vm12 = vmand %vm195_vm5, %vm1533_vm6 }
  0xe3   :  { %vm1223_vm14 = vmpackc.low %vm270_vm12, %vm268_vm9 }
  0xe4   :  { %1224 = vmatprep.subr.msk.bf16.mxu0 %vm1223_vm14, %v1438_v10  ;;  %vm586_vm15 = vmand %vm511_vm11, %vm1546_vm10  ;;  %vm512_vm11 = vcmp.eq.s32.totalorder %v86_v38, %v1555_v8  ;;  %vm197_vm14 = vcmp.eq.s32.totalorder %v87_v39, %v1531_v1 }
  0xe5   :  { %vm588_vm2 = vmand %vm513_vm13, %vm1546_vm10 }
  0xe6   :  { %vm1287_vm4 = vmpackc.low %vm588_vm2, %vm586_vm15 }
  0xe7   :  { %1288 = vmatprep.subr.msk.bf16.mxu1 %vm1287_vm4, %v1438_v10  ;;  %vm267_vm5 = vmand %vm192_vm0, %vm1562_vm1  ;;  %vm199_vm0 = vcmp.eq.s32.totalorder %v88_v40, %v1531_v1  ;;  %vm515_vm4 = vcmp.eq.s32.totalorder %v87_v39, %v1544_v6 }
  0xe8   :  { %vm269_vm9 = vmand %vm194_vm3, %vm1562_vm1 }
  0xe9   :  { %vm1225_vm12 = vmpackc.low %vm269_vm9, %vm267_vm5 }
  0xea   :  { %1226 = vmatpush1.bf16.msk.msra.mxu0 %vm1225_vm12, %v1438_v10  ;;  %vm585_vm13 = vmand %vm510_vm7, %vm1575_vm8  ;;  %vm517_vm7 = vcmp.eq.s32.totalorder %v88_v40, %v1544_v6  ;;  %vm196_vm12 = vcmp.eq.s32.totalorder %v87_v39, %v1540_v4 }
  0xeb   :  { %vm587_vm15 = vmand %vm512_vm11, %vm1575_vm8 }
  0xec   :  { %vm1289_vm2 = vmpackc.low %vm587_vm15, %vm585_vm13 }
  0xed   :  { %1290 = vmatpush1.bf16.msk.msra.mxu1 %vm1289_vm2, %v1438_v10  ;;  %vm272_vm3 = vmand %vm197_vm14, %vm1533_vm6  ;;  %vm198_vm14 = vcmp.eq.s32.totalorder %v88_v40, %v1540_v4  ;;  %vm514_vm2 = vcmp.eq.s32.totalorder %v87_v39, %v1555_v8 }
  0xee   :  { %vm274_vm5 = vmand %vm199_vm0, %vm1533_vm6 }
  0xef   :  { %vm1227_vm9 = vmpackc.low %vm274_vm5, %vm272_vm3 }
  0xf0   :  { %1228 = vmatprep.subr.msk.bf16.mxu0 %vm1227_vm9, %v1438_v10  ;;  %vm590_vm11 = vmand %vm515_vm4, %vm1546_vm10  ;;  %vm516_vm4 = vcmp.eq.s32.totalorder %v88_v40, %v1555_v8  ;;  %vm201_vm9 = vcmp.eq.s32.totalorder %v89_v41, %v1531_v1 }
  0xf1   :  { %vm592_vm13 = vmand %vm517_vm7, %vm1546_vm10 }
  0xf2   :  { %vm1291_vm15 = vmpackc.low %vm592_vm13, %vm590_vm11 }
  0xf3   :  { %1292 = vmatprep.subr.msk.bf16.mxu1 %vm1291_vm15, %v1438_v10  ;;  %vm271_vm0 = vmand %vm196_vm12, %vm1562_vm1  ;;  %vm203_vm12 = vcmp.eq.s32.totalorder %v90_v42, %v1531_v1  ;;  %vm519_vm15 = vcmp.eq.s32.totalorder %v89_v41, %v1544_v6 }
  0xf4   :  { %vm273_vm3 = vmand %vm198_vm14, %vm1562_vm1 }
  0xf5   :  { %vm1229_vm5 = vmpackc.low %vm273_vm3, %vm271_vm0 }
  0xf6   :  { %1230 = vmatpush1.bf16.msk.msra.mxu0 %vm1229_vm5, %v1438_v10  ;;  %vm589_vm7 = vmand %vm514_vm2, %vm1575_vm8  ;;  %vm521_vm2 = vcmp.eq.s32.totalorder %v90_v42, %v1544_v6  ;;  %vm200_vm5 = vcmp.eq.s32.totalorder %v89_v41, %v1540_v4 }
  0xf7   :  { %vm591_vm11 = vmand %vm516_vm4, %vm1575_vm8 }
  0xf8   :  { %vm1293_vm13 = vmpackc.low %vm591_vm11, %vm589_vm7 }
  0xf9   :  { %1294 = vmatpush1.bf16.msk.msra.mxu1 %vm1293_vm13, %v1438_v10  ;;  %vm276_vm14 = vmand %vm201_vm9, %vm1533_vm6  ;;  %vm202_vm9 = vcmp.eq.s32.totalorder %v90_v42, %v1540_v4  ;;  %vm518_vm13 = vcmp.eq.s32.totalorder %v89_v41, %v1555_v8 }
  0xfa   :  { %vm278_vm0 = vmand %vm203_vm12, %vm1533_vm6 }
  0xfb   :  { %vm1231_vm3 = vmpackc.low %vm278_vm0, %vm276_vm14 }
  0xfc   :  { %1232 = vmatprep.subr.msk.bf16.mxu0 %vm1231_vm3, %v1438_v10  ;;  %vm594_vm4 = vmand %vm519_vm15, %vm1546_vm10  ;;  %vm520_vm15 = vcmp.eq.s32.totalorder %v90_v42, %v1555_v8  ;;  %vm205_vm3 = vcmp.eq.s32.totalorder %v91_v43, %v1531_v1 }
  0xfd   :  { %vm596_vm7 = vmand %vm521_vm2, %vm1546_vm10 }
  0xfe   :  { %vm1295_vm11 = vmpackc.low %vm596_vm7, %vm594_vm4 }
  0xff   :  { %1296 = vmatprep.subr.msk.bf16.mxu1 %vm1295_vm11, %v1438_v10  ;;  %vm275_vm12 = vmand %vm200_vm5, %vm1562_vm1  ;;  %vm207_vm5 = vcmp.eq.s32.totalorder %v92_v44, %v1531_v1  ;;  %vm523_vm11 = vcmp.eq.s32.totalorder %v91_v43, %v1544_v6 }
 0x100   :  { %vm277_vm14 = vmand %vm202_vm9, %vm1562_vm1 }
 0x101   :  { %vm1233_vm0 = vmpackc.low %vm277_vm14, %vm275_vm12 }
 0x102   :  { %1234 = vmatpush1.bf16.msk.msra.mxu0 %vm1233_vm0, %v1438_v10  ;;  %vm593_vm2 = vmand %vm518_vm13, %vm1575_vm8  ;;  %vm525_vm13 = vcmp.eq.s32.totalorder %v92_v44, %v1544_v6  ;;  %vm204_vm0 = vcmp.eq.s32.totalorder %v91_v43, %v1540_v4 }
 0x103   :  { %vm595_vm4 = vmand %vm520_vm15, %vm1575_vm8 }
 0x104   :  { %vm1297_vm7 = vmpackc.low %vm595_vm4, %vm593_vm2 }
 0x105   :  { %1298 = vmatpush1.bf16.msk.msra.mxu1 %vm1297_vm7, %v1438_v10  ;;  %vm280_vm9 = vmand %vm205_vm3, %vm1533_vm6  ;;  %vm206_vm3 = vcmp.eq.s32.totalorder %v92_v44, %v1540_v4 }
 0x106   :  { %vm282_vm12 = vmand %vm207_vm5, %vm1533_vm6  ;;  %vm522_vm5 = vcmp.eq.s32.totalorder %v91_v43, %v1555_v8 }
 0x107   :  { %vm1235_vm14 = vmpackc.low %vm282_vm12, %vm280_vm9  ;;  %vm524_vm9 = vcmp.eq.s32.totalorder %v92_v44, %v1555_v8 }
 0x108   :  { %1236 = vmatprep.subr.msk.bf16.mxu0 %vm1235_vm14, %v1438_v10  ;;  %vm598_vm15 = vmand %vm523_vm11, %vm1546_vm10 }
 0x109   :  { %vm600_vm2 = vmand %vm525_vm13, %vm1546_vm10 }
 0x10a   :  { %vm1299_vm4 = vmpackc.low %vm600_vm2, %vm598_vm15 }
 0x10b   :  { %1300 = vmatprep.subr.msk.bf16.mxu1 %vm1299_vm4, %v1438_v10  ;;  %vm279_vm6 = vmand %vm204_vm0, %vm1562_vm1 }
 0x10c   :  { %vm281_vm7 = vmand %vm206_vm3, %vm1562_vm1 }
 0x10d   :  { %vm1237_vm11 = vmpackc.low %vm281_vm7, %vm279_vm6 }
 0x10e   :  { %1238 = vmatpush1.bf16.msk.msra.mxu0 %vm1237_vm11, %v1438_v10  ;;  %vm597_vm10 = vmand %vm522_vm5, %vm1575_vm8 }
 0x10f   :  { %vm599_vm12 = vmand %vm524_vm9, %vm1575_vm8 }
 0x110   :  { %vm1301_vm13 = vmpackc.low %vm599_vm12, %vm597_vm10 }
 0x111   :  { %1302 = vmatpush1.bf16.msk.msra.mxu1 %vm1301_vm13, %v1438_v10  ;;  %860 = vmatmul.mubr.f32.vlgmr.msra.gmra.mrb[0].mxu0 %v729_v31 }
 0x114   :  { %997 = vmatmul.mubr.f32.vlgmr.msra.gmra.mrb[0].mxu1 %v729_v31 }
 0x1e4   :  { %v861_v45 = vpop.f32.mrb[0].mxu0 }
 0x1e5   :  { %866 = vst [vmem:[#allocation11] sm:$0xff] %v861_v45  ;;  %v863_v46 = vpop.f32.mrb[1].mxu0 }
 0x1e6   :  { %867 = vst [vmem:[#allocation11 + $0x8] sm:$0xff] %v863_v46 }
 0x1e7   :  { %v998_v47 = vpop.f32.mrb[0].mxu1 }
 0x1e8   :  { %1391 = shalt.err (!%p1388_p9)
}
 0x1e9   :  { %s1392_s12 = scalar_lea.hbm %s2071_s3, 256 }
 0x1ea   :  { %p1393_p10 = scmp.ne.s32.totalorder %s2071_s3, %s1392_s12  ;;  %p1396_p11 = scmp.lt.u32.totalorder %s1392_s12, %s2071_s3 }
 0x1ec   :  { %p1398_p12 = pnand %p1396_p11, %p1393_p10 }
 0x1ee   :  { %1401 = shalt.err (!%p1398_p12)
}
 0x1ef   :  { %1014 = dma.vmem_to_hbm [thread:$0]  %s1012_s7, 256, %s2071_s3, [#allocation6]   ;;  %1003 = vst [vmem:[#allocation12] sm:$0xff] %v998_v47  ;;  %v1000_v48 = vpop.f32.mrb[1].mxu1 }
 0x1f0   :  { %1004 = vst [vmem:[#allocation12 + $0x8] sm:$0xff] %v1000_v48  ;;  %s1402_s19 = scalar_lea.vmem %s2037_s9, 256  ;;  %p1407_p0 = scmp.lt.s32.totalorder %s2037_s9, %s2037_s9 }
 0x1f1   :  { %p1403_p13 = scmp.ne.s32.totalorder %s2037_s9, %s1402_s19  ;;  %p1408_p1 = scmp.lt.s32.totalorder %s1402_s19, %s1402_s19 }
 0x1f3   :  { %p1409_p2 = por %p1408_p1, %p1407_p0 }
 0x1f5   :  { %p1410_p3 = pnand %p1409_p2, %p1403_p13 }
 0x1f7   :  { %1413 = shalt.err (!%p1410_p3)
}
 0x1f8   :  { %s1414_s21 = scalar_lea.hbm %s2072_s4, 256 }
 0x1f9   :  { %p1415_p4 = scmp.ne.s32.totalorder %s2072_s4, %s1414_s21  ;;  %p1418_p5 = scmp.lt.u32.totalorder %s1414_s21, %s2072_s4 }
 0x1fb   :  { %p1420_p6 = pnand %p1418_p5, %p1415_p4 }
 0x1fd   :  { %1423 = shalt.err (!%p1420_p6)
}
 0x1fe   :  { %1024 = dma.vmem_to_hbm [thread:$0]  %s2037_s9, 256, %s2072_s4, [#allocation13]  }
 0x1ff   :  { %1430 = dma.done.wait [#allocation6], 256  }
 0x200   :  { %1431 = vsyncadd [#allocation6], 4294967040 }
 0x201   :  { %1432 = dma.done.wait [#allocation13], 256  }
 0x202   :  { %1433 = vsyncadd [#allocation13], 4294967040 }
 0x203   :  { %1031 = vsyncpa [#allocation5], 1 }
 0x204   :  { %1032 = vsyncpa [#allocation10], 1 }
 0x205   :  { %1033 = vsyncpa [#allocation6], 1 }
 0x206   :  { %1034 = vsyncpa [#allocation13], 1 }
 0x207   :  { %1035 = vsyncpa [#allocation7], 1 }

</bundles_post_ra>
